<compile_context>
chip_gen: v5e
topology: v5e:2x2
jax: 0.10.0
libtpu: 0.0.40
codegen_flags: <defaults>
</compile_context>

<pallas_src>
import math

import jax
import jax.numpy as jnp
from jax import lax
from jax.experimental import pallas as pl
from jax.experimental.pallas import tpu as pltpu

_HP = 128  # padded hidden width (lane-full); real hidden dims are 64 and 32


def _round_up(x, m):
    return ((x + m - 1) // m) * m


def _make_kernel(sdp):
    """sdp = state_dim padded to a multiple of 8 (static)."""

    def kernel(x_ref, w_ref, o_ref):
        bf16, f32 = jnp.bfloat16, jnp.float32
        # Streamed state tile: f32 in HBM/VMEM, cast to bf16 for the MXU.
        x = x_ref[...].astype(bf16)                        # (TB, sdp)
        # Static slices into the packed bf16 parameter slab (no extra DMAs).
        w1 = w_ref[0:sdp, :]                               # (sdp, 128)
        b1 = w_ref[sdp:sdp + 1, :].astype(f32)             # (1, 128)
        w2 = w_ref[sdp + 8:sdp + 136, :]                   # (128, 128)
        b2 = w_ref[sdp + 136:sdp + 137, :].astype(f32)     # (1, 128)
        w3 = w_ref[sdp + 144:sdp + 145, :]                 # (1, 128)  (W3 row)
        b3 = w_ref[sdp + 145:sdp + 146, 0:1].astype(f32)   # (1, 1)

        h1 = jnp.maximum(
            jnp.dot(x, w1, preferred_element_type=f32) + b1, 0.0)
        h2 = jnp.maximum(
            jnp.dot(h1.astype(bf16), w2, preferred_element_type=f32) + b2, 0.0)
        # Final layer as w3 . h2^T -> lane-dense (1, TB) output tile.  This is
        # the MXU-native "A @ B^T" contraction (same as flash-attn q @ k^T), so
        # no transposed copy of h2 is materialized.
        v = lax.dot_general(w3, h2.astype(bf16), (((1,), (1,)), ((), ())),
                            preferred_element_type=f32)
        o_ref[...] = (v + b3).astype(o_ref.dtype)

    return kernel


def pack_params(params, state_dim):
    """Pack W1,b1,W2,b2,W3,b3 into one zero-padded (SDP+152, 128) bf16 slab."""
    sdp = _round_up(state_dim, 8)
    bf16 = jnp.bfloat16

    def pad2(a, rows, cols):
        a = jnp.asarray(a, bf16)
        out = jnp.zeros((rows, cols), bf16)
        return out.at[:a.shape[0], :a.shape[1]].set(a)

    w1p = pad2(params["W1"], sdp, _HP)                        # rows [0, sdp)
    b1p = pad2(jnp.reshape(params["b1"], (1, -1)), 8, _HP)    # [sdp, sdp+8)
    w2p = pad2(params["W2"], _HP, _HP)                        # [sdp+8, sdp+136)
    b2p = pad2(jnp.reshape(params["b2"], (1, -1)), 8, _HP)    # [sdp+136, sdp+144)
    w3b3 = jnp.zeros((8, _HP), bf16)                          # [sdp+144, sdp+152)
    w3_row = jnp.reshape(jnp.asarray(params["W3"], bf16), (-1,))
    w3b3 = w3b3.at[0, :w3_row.shape[0]].set(w3_row)
    w3b3 = w3b3.at[1, 0].set(jnp.reshape(jnp.asarray(params["b3"], bf16), ()))
    return jnp.concatenate([w1p, b1p, w2p, b2p, w3b3], axis=0)


def _pick_tb(batch, sdp):
    """Batch-tile rows: big tiles to amortize the ~0.35us/step grid overhead,
    capped by a VMEM budget, and split >=2 ways so both v7x TCs get work."""
    # Per-row VMEM footprint: double-buffered f32 x tile + ~3 (row,128) f32 temps.
    per_row = 2 * sdp * 4 + 3 * _HP * 4
    budget = 24 * 1024 * 1024          # stay well under the 32 MiB scoped limit
    cap = max(128, min(4096, (budget // per_row) // 128 * 128))
    if batch <= 128:
        return 128
    # >= 2 grid steps whenever there is enough work to split across 2 cores.
    half = _round_up(pl.cdiv(batch, 2), 128)
    return min(cap, half)


def critic_forward(state, params):
    """state: (B, state_dim) f32.  params: dict of W1,b1,W2,b2,W3,b3."""
    B, state_dim = state.shape
    sdp = _round_up(state_dim, 8)
    slab = pack_params(params, state_dim)                 # (sdp+152, 128) bf16

    x = state.astype(jnp.float32)
    if sdp != state_dim:
        # Padded *columns* must be exact zeros (they hit real contraction rows);
        # padded batch *rows* need no copy — the cdiv grid masks the tail and
        # their outputs are discarded below.
        x = jnp.pad(x, ((0, 0), (0, sdp - state_dim)))

    tb = _pick_tb(B, sdp)
    nb = pl.cdiv(B, tb)
    bout = nb * tb    # fully-tiled lane-dense output; tail columns sliced off.

    flops = 2 * B * (sdp * _HP + _HP * _HP + _HP)
    bytes_accessed = B * sdp * 4 + slab.size * slab.dtype.itemsize + bout * 4

    out = pl.pallas_call(
        _make_kernel(sdp),
        out_shape=jax.ShapeDtypeStruct((1, bout), jnp.float32),
        grid_spec=pltpu.PrefetchScalarGridSpec(
            num_scalar_prefetch=0,
            grid=(nb,),
            in_specs=[
                pl.BlockSpec((tb, sdp), lambda i: (i, 0)),     # streamed state
                pl.BlockSpec(slab.shape, lambda i: (0, 0)),    # resident weights
            ],
            out_specs=pl.BlockSpec((1, tb), lambda i: (0, i)),  # lane-dense out
        ),
        compiler_params=pltpu.CompilerParams(
            dimension_semantics=("parallel",),
            vmem_limit_bytes=32 * 1024 * 1024),
        cost_estimate=pl.CostEstimate(
            flops=flops, transcendentals=0, bytes_accessed=bytes_accessed),
    )(x, slab)

    return out[0, :B].reshape(B, 1)


def init_params(key, state_dim, hidden_dim=64):
    """Deterministic init mimicking nn.Linear default (U[-1/sqrt(fan_in), ..])."""
    def linear(key, fan_in, fan_out):
        kw, kb = jax.random.split(key)
        bound = 1.0 / math.sqrt(fan_in)
        # Stored as (in, out) so the math is x @ W.
        w = jax.random.uniform(kw, (fan_in, fan_out), jnp.float32, -bound, bound)
        b = jax.random.uniform(kb, (1, fan_out), jnp.float32, -bound, bound)
        return w, b

    k1, k2, k3 = jax.random.split(key, 3)
    W1, b1 = linear(k1, state_dim, hidden_dim)
    W2, b2 = linear(k2, hidden_dim, 32)
    W3, b3 = linear(k3, 32, 1)
    return {"W1": W1, "b1": b1, "W2": W2, "b2": b2, "W3": W3, "b3": b3}


def critic_ref(state, params):
    """Pure-JAX f32 reference (matches the PyTorch module)."""
    h1 = jnp.maximum(state @ params["W1"] + params["b1"], 0.0)
    h2 = jnp.maximum(h1 @ params["W2"] + params["b2"], 0.0)
    return h2 @ params["W3"] + params["b3"]


def critic_ref_bf16(state, params):
    """Reference with the same bf16-in / f32-accumulate rounding as the kernel."""
    bf16, f32 = jnp.bfloat16, jnp.float32

    def lin(a, w, b):
        return (jnp.dot(a.astype(bf16), w.astype(bf16),
                        preferred_element_type=f32)
                + b.astype(bf16).astype(f32))

    h1 = jnp.maximum(lin(state, params["W1"], params["b1"]), 0.0)
    h2 = jnp.maximum(lin(h1, params["W2"], params["b2"]), 0.0)
    return lin(h2, params["W3"], params["b3"])


if __name__ == "__main__":
    key = jax.random.PRNGKey(0)
    k_params, k_s1, k_s2 = jax.random.split(key, 3)

    state_dim, hidden_dim = 16, 64
    params = init_params(k_params, state_dim, hidden_dim)

    # Small batch: single (partial) tile.
    s1 = jax.random.normal(k_s1, (8, state_dim), jnp.float32)
    v1 = critic_forward(s1, params)
    jax.block_until_ready(v1)
    assert v1.shape == (8, 1), v1.shape
    assert jnp.allclose(v1, critic_ref_bf16(s1, params), atol=1e-3, rtol=1e-3), (
        "mismatch vs. bf16-matched reference (small batch)")
    assert jnp.allclose(v1, critic_ref(s1, params), atol=1e-1, rtol=1e-1), (
        "mismatch vs. f32 reference (small batch)")

    # Ragged multi-tile batch: grid > 1 with a masked tail tile.
    s2 = jax.random.normal(k_s2, (300, state_dim), jnp.float32)
    v2 = critic_forward(s2, params)
    jax.block_until_ready(v2)
    assert v2.shape == (300, 1), v2.shape
    assert jnp.allclose(v2, critic_ref_bf16(s2, params), atol=1e-3, rtol=1e-3), (
        "mismatch vs. bf16-matched reference (ragged batch)")
    assert jnp.allclose(v2, critic_ref(s2, params), atol=1e-1, rtol=1e-1), (
        "mismatch vs. f32 reference (ragged batch)")

    print("KERNEL_OK")
</pallas_src>

<mosaic_0001>
module attributes {stable_mosaic.version = 11 : i64} {
  func.func @kernel(%arg0: i32, %arg1: memref<128x16xf32, #tpu.memory_space<vmem>>, %arg2: memref<168x128xbf16, #tpu.memory_space<vmem>>, %arg3: memref<1x128xf32, #tpu.memory_space<vmem>>) attributes {dimension_semantics = [#tpu.dimension_semantics<parallel>], iteration_bounds = array<i64: 1>, scalar_prefetch = 0 : i64, scratch_operands = 0 : i64, tpu.core_type = #tpu.core_type<tc>, window_params = [{transform_indices = @transform_0, window_bounds = array<i64: 128, 16>}, {pipeline_mode = #tpu.pipeline_mode<synchronous>, transform_indices = @transform_1, window_bounds = array<i64: 168, 128>}, {transform_indices = @transform_2, window_bounds = array<i64: 1, 128>}]} {
    %c0 = arith.constant 0 : index
    %c0_0 = arith.constant 0 : index
    %0 = vector.load %arg1[%c0, %c0_0] : memref<128x16xf32, #tpu.memory_space<vmem>>, vector<128x16xf32>
    %1 = arith.truncf %0 : vector<128x16xf32> to vector<128x16xbf16>
    %c0_1 = arith.constant 0 : index
    %c0_2 = arith.constant 0 : index
    %2 = vector.load %arg2[%c0_1, %c0_2] : memref<168x128xbf16, #tpu.memory_space<vmem>>, vector<16x128xbf16>
    %c16 = arith.constant 16 : index
    %c0_3 = arith.constant 0 : index
    %3 = vector.load %arg2[%c16, %c0_3] : memref<168x128xbf16, #tpu.memory_space<vmem>>, vector<1x128xbf16>
    %4 = arith.extf %3 : vector<1x128xbf16> to vector<1x128xf32>
    %c24 = arith.constant 24 : index
    %c0_4 = arith.constant 0 : index
    %5 = vector.load %arg2[%c24, %c0_4] : memref<168x128xbf16, #tpu.memory_space<vmem>>, vector<128x128xbf16>
    %c152 = arith.constant 152 : index
    %c0_5 = arith.constant 0 : index
    %6 = vector.load %arg2[%c152, %c0_5] : memref<168x128xbf16, #tpu.memory_space<vmem>>, vector<1x128xbf16>
    %7 = arith.extf %6 : vector<1x128xbf16> to vector<1x128xf32>
    %c160 = arith.constant 160 : index
    %c0_6 = arith.constant 0 : index
    %8 = vector.load %arg2[%c160, %c0_6] : memref<168x128xbf16, #tpu.memory_space<vmem>>, vector<1x128xbf16>
    %c161 = arith.constant 161 : index
    %c0_7 = arith.constant 0 : index
    %9 = vector.load %arg2[%c161, %c0_7] : memref<168x128xbf16, #tpu.memory_space<vmem>>, vector<1x1xbf16>
    %10 = arith.extf %9 : vector<1x1xbf16> to vector<1x1xf32>
    %cst = arith.constant dense<0.000000e+00> : vector<128x128xf32>
    %11 = tpu.matmul %1, %2, %cst {dimension_numbers = #tpu.dot_dimension_numbers<[1], [0], [0], [1], [0, 0, 1, 1], [], []>} : vector<128x16xbf16>, vector<16x128xbf16>, vector<128x128xf32> -> vector<128x128xf32>
    %12 = vector.broadcast %4 : vector<1x128xf32> to vector<128x128xf32>
    %13 = arith.addf %11, %12 : vector<128x128xf32>
    %cst_8 = arith.constant 0.000000e+00 : f32
    %14 = vector.broadcast %cst_8 : f32 to vector<128x128xf32>
    %15 = arith.maximumf %13, %14 : vector<128x128xf32>
    %16 = arith.truncf %15 : vector<128x128xf32> to vector<128x128xbf16>
    %cst_9 = arith.constant dense<0.000000e+00> : vector<128x128xf32>
    %17 = tpu.matmul %16, %5, %cst_9 {dimension_numbers = #tpu.dot_dimension_numbers<[1], [0], [0], [1], [0, 0, 1, 1], [], []>} : vector<128x128xbf16>, vector<128x128xbf16>, vector<128x128xf32> -> vector<128x128xf32>
    %18 = vector.broadcast %7 : vector<1x128xf32> to vector<128x128xf32>
    %19 = arith.addf %17, %18 : vector<128x128xf32>
    %cst_10 = arith.constant 0.000000e+00 : f32
    %20 = vector.broadcast %cst_10 : f32 to vector<128x128xf32>
    %21 = arith.maximumf %19, %20 : vector<128x128xf32>
    %22 = arith.truncf %21 : vector<128x128xf32> to vector<128x128xbf16>
    %cst_11 = arith.constant dense<0.000000e+00> : vector<1x128xf32>
    %23 = tpu.matmul %8, %22, %cst_11 {dimension_numbers = #tpu.dot_dimension_numbers<[1], [1], [0], [0], [0, 0, 1, 0], [], []>} : vector<1x128xbf16>, vector<128x128xbf16>, vector<1x128xf32> -> vector<1x128xf32>
    %24 = vector.broadcast %10 : vector<1x1xf32> to vector<1x128xf32>
    %25 = arith.addf %23, %24 : vector<1x128xf32>
    %c0_12 = arith.constant 0 : index
    %c0_13 = arith.constant 0 : index
    %26 = vector.load %arg3[%c0_12, %c0_13] : memref<1x128xf32, #tpu.memory_space<vmem>>, vector<1x128xf32>
    tpu.vector_store %arg3[%c0_12, %c0_13], %25 {strides = array<i32>} : memref<1x128xf32, #tpu.memory_space<vmem>>, vector<1x128xf32>,
    return
  }
  func.func @transform_0(%arg0: i32) -> (i32, i32) {
    %c0_i32 = arith.constant 0 : i32
    %c0_i32_0 = arith.constant 0 : i32
    return %arg0, %c0_i32 : i32, i32
  }
  func.func @transform_1(%arg0: i32) -> (i32, i32) {
    %c0_i32 = arith.constant 0 : i32
    %c0_i32_0 = arith.constant 0 : i32
    %c0_i32_1 = arith.constant 0 : i32
    return %c0_i32, %c0_i32_0 : i32, i32
  }
  func.func @transform_2(%arg0: i32) -> (i32, i32) {
    %c0_i32 = arith.constant 0 : i32
    %c0_i32_0 = arith.constant 0 : i32
    return %c0_i32, %arg0 : i32, i32
  }
}

</mosaic_0001>

<bundles_post_ra>
// kernel: tpu_custom_call.1
= control target key start
LH: loop header
LB: loop body
LE: loop exit
PB: predicated region body
PF: predicated region fallthrough
CT: control target
= control target key end

     0   :  { %7 = vsyncpa [#allocation3], 0  ;;  %s546_s0 = inlined_call_operand.hbm [shape: f32[8,16], index: 0, kind: input, shape index: {}]   ;;  %s547_s1 = inlined_call_operand.hbm [shape: bf16[168,128], index: 1, kind: input, shape index: {}]   ;;  %s548_s2 = inlined_call_operand.hbm [shape: f32[1,128], index: 2, kind: output, shape index: {}]  }
   0x1   :  { %8 = vsyncpa [#allocation6], 0 }
   0x2   :  { %9 = vsyncpa [#allocation4], 0 }
   0x3   :  { %13 = vsyncadd [#allocation3], 1920  ;;  %s14_s11 = sshll.u32 %s546_s0, 4  ;;  %s506_s12 = smov [#allocation2]   ;;  %s15_s11 = int_to_ptr.hbm [resolvable:$true] %s14_s11 }
   0x4   :  { %s16_s13 = sshll.u32 %s506_s12, 4  ;;  %s27_s16 = sshll.u32 %s547_s1, 4  ;;  %s17_s13 = int_to_ptr.vmem [resolvable:$true] %s16_s13  ;;  %s28_s16 = int_to_ptr.hbm [resolvable:$true] %s27_s16 }
   0x5   :  { %s507_s17 = smov 128   ;;  %s508_s18 = smov 8  }
   0x6   :  { %22 = dma.hbm_to_vmem [thread:$0]  %s15_s11, 128, %s17_s13, [#allocation3], %s507_s17, %s507_s17, %s508_s18  }
   0x7   :  { %s509_s19 = smov [#allocation5]   ;;  %s510_s21 = smov 64  }
   0x8   :  { %s29_s20 = sshll.u32 %s509_s19, 4  ;;  %s511_s22 = smov 4   ;;  %s30_s20 = int_to_ptr.vmem [resolvable:$true] %s29_s20 }
   0x9   :  { %35 = dma.hbm_to_vmem [thread:$0]  %s28_s16, 1344, %s30_s20, [#allocation6], %s510_s21, %s510_s21, %s511_s22  }
   0xa   :  { %500 = dma.done.wait [#allocation3], 2048  }
   0xb   :  { %501 = vsyncadd [#allocation3], 4294965248 }
   0xc   :  { %502 = dma.done.wait [#allocation6], 1344  }
   0xd   :  { %503 = vsyncadd [#allocation6], 4294965952  ;;  %v402_v0 = vld [vmem:[#allocation5] sm:$0xff]  ;;  %v46_v2 = vld [vmem:[#allocation2 + $0x8] sm:$0xff]  ;;  %vm100_vm0 = vcmask 130048   ;;  %s513_s0 = smov [#allocation7]  }
   0xe   :  { %v45_v1 = vld [vmem:[#allocation2] sm:$0xff]  ;;  %132 = vmatpush.bf16.msra.mxu0 %v402_v0  ;;  %v47_v4 = vld [vmem:[#allocation2 + $0x10] sm:$0xff]  ;;  %v48_v5 = vld [vmem:[#allocation2 + $0x18] sm:$0xff]  ;;  %s345_s1 = sshll.u32 %s513_s0, 4  ;;  %s347_s25 = sshll.u32 %s548_s2, 4  ;;  %s346_s1 = int_to_ptr.vmem [resolvable:$true] %s345_s1  ;;  %s348_s25 = int_to_ptr.hbm [resolvable:$true] %s347_s25 }
   0xf   :  { %v61_v3 = vpack.c.bf16 %v46_v2, %v45_v1  ;;  %v62_v6 = vpack.c.bf16 %v48_v5, %v47_v4  ;;  %v49_v7 = vld [vmem:[#allocation2 + $0x20] sm:$0xff]  ;;  %v50_v8 = vld [vmem:[#allocation2 + $0x28] sm:$0xff]  ;;  %v51_v10 = vld [vmem:[#allocation2 + $0x30] sm:$0xff] }
  0x10   :  { %v63_v9 = vpack.c.bf16 %v50_v8, %v49_v7  ;;  %v52_v11 = vld [vmem:[#allocation2 + $0x38] sm:$0xff]  ;;  %v53_v13 = vld [vmem:[#allocation2 + $0x40] sm:$0xff]  ;;  %v54_v14 = vld [vmem:[#allocation2 + $0x48] sm:$0xff] }
  0x11   :  { %362 = vmatmul.msk.bf16.vlgmr.msra.gmra.mxu0 %vm100_vm0, %v61_v3  ;;  %v64_v12 = vpack.c.bf16 %v52_v11, %v51_v10  ;;  %v65_v15 = vpack.c.bf16 %v54_v14, %v53_v13  ;;  %v410_v16 = vld [vmem:[#allocation5 + $0x44] sm:$0xff]  ;;  %v55_v17 = vld [vmem:[#allocation2 + $0x50] sm:$0xff]  ;;  %v56_v18 = vld [vmem:[#allocation2 + $0x58] sm:$0xff] }
  0x12   :  { %247 = vmatpush.bf16.msra.mxu1 %v410_v16  ;;  %411 = vmatpush.bf16.msra.mxu3 %v410_v16  ;;  %v66_v19 = vpack.c.bf16 %v56_v18, %v55_v17  ;;  %v409_v20 = vld [vmem:[#allocation5 + $0x3c] sm:$0xff]  ;;  %v408_v21 = vld [vmem:[#allocation5 + $0x34] sm:$0xff]  ;;  %v407_v22 = vld [vmem:[#allocation5 + $0x2c] sm:$0xff] }
  0x13   :  { %v57_v23 = vld [vmem:[#allocation2 + $0x60] sm:$0xff]  ;;  %v58_v24 = vld [vmem:[#allocation2 + $0x68] sm:$0xff]  ;;  %v404_v28 = vld [vmem:[#allocation5 + $0x14] sm:$0xff] }
  0x14   :  { %v406_v25 = vld [vmem:[#allocation5 + $0x24] sm:$0xff]  ;;  %v67_v26 = vpack.c.bf16 %v58_v24, %v57_v23  ;;  %v405_v27 = vld [vmem:[#allocation5 + $0x1c] sm:$0xff]  ;;  %v403_v29 = vld [vmem:[#allocation5 + $0xc] sm:$0xff] }
  0x15   :  { %v59_v30 = vld [vmem:[#allocation2 + $0x70] sm:$0xff]  ;;  %v60_v31 = vld [vmem:[#allocation2 + $0x78] sm:$0xff]  ;;  %v71_v33 = vld [vmem:[#allocation5 + $0x8] sm:$0x1] }
  0x16   :  { %248 = vmatpush.bf16.msra.mxu1 %v409_v20  ;;  %412 = vmatpush.bf16.msra.mxu3 %v409_v20  ;;  %v68_v32 = vpack.c.bf16 %v60_v31, %v59_v30  ;;  %v72_v34 = vunpack.c.l.bf16 %v71_v33 }
  0x18   :  { %v93_v36 = vperm.slane %v72_v34, 0 }
  0x1a   :  { %249 = vmatpush.bf16.msra.mxu1 %v408_v21  ;;  %413 = vmatpush.bf16.msra.mxu3 %v408_v21 }
  0x1e   :  { %250 = vmatpush.bf16.msra.mxu1 %v407_v22  ;;  %414 = vmatpush.bf16.msra.mxu3 %v407_v22 }
  0x21   :  { %363 = vmatmul.msk.bf16.gmra.mxu0 %vm100_vm0, %v62_v6 }
  0x22   :  { %251 = vmatpush.bf16.msra.mxu1 %v406_v25  ;;  %415 = vmatpush.bf16.msra.mxu3 %v406_v25 }
  0x26   :  { %252 = vmatpush.bf16.msra.mxu1 %v405_v27  ;;  %416 = vmatpush.bf16.msra.mxu3 %v405_v27 }
  0x2a   :  { %253 = vmatpush.bf16.msra.mxu1 %v404_v28  ;;  %417 = vmatpush.bf16.msra.mxu3 %v404_v28  ;;  %v89_v28 = vld [vmem:[#allocation5 + $0x4c] sm:$0x1] }
  0x2e   :  { %254 = vmatpush.bf16.msra.mxu1 %v403_v29  ;;  %418 = vmatpush.bf16.msra.mxu3 %v403_v29  ;;  %v90_v29 = vunpack.c.l.bf16 %v89_v28 }
  0x30   :  { %v198_v31 = vperm.slane %v90_v29, 0 }
  0x31   :  { %364 = vmatmul.msk.bf16.gmra.mxu0 %vm100_vm0, %v63_v9 }
  0x41   :  { %365 = vmatmul.msk.bf16.gmra.mxu0 %vm100_vm0, %v64_v12 }
  0x51   :  { %366 = vmatmul.msk.bf16.gmra.mxu0 %vm100_vm0, %v65_v15 }
  0x61   :  { %367 = vmatmul.msk.bf16.gmra.mxu0 %vm100_vm0, %v66_v19 }
  0x71   :  { %368 = vmatmul.msk.bf16.gmra.mxu0 %vm100_vm0, %v67_v26 }
  0x81   :  { %369 = vmatmul.msk.bf16.gmra.mxu0 %vm100_vm0, %v68_v32 }
  0x8e   :  { %v134_v35 = vpop.f32.mrf.mxu0 }
  0x8f   :  { %v135_v37 = vadd.f32 %v134_v35, %v93_v36 }
  0x91   :  { %v174_v40 = vmax.f32 %v135_v37, 0.0 }
  0x96   :  { %v136_v38 = vpop.f32.mrf.mxu0 }
  0x97   :  { %v137_v39 = vadd.f32 %v136_v38, %v93_v36 }
  0x99   :  { %v175_v41 = vmax.f32 %v137_v39, 0.0 }
  0x9b   :  { %v190_v42 = vpack.c.bf16 %v175_v41, %v174_v40 }
  0x9d   :  { %255 = vmatmul.bf16.vlgmr.msra.gmra.mxu1 %v190_v42 }
  0x9e   :  { %v139_v43 = vpop.f32.mrf.mxu0 }
  0x9f   :  { %v140_v44 = vadd.f32 %v139_v43, %v93_v36 }
  0xa1   :  { %v176_v47 = vmax.f32 %v140_v44, 0.0 }
  0xa6   :  { %v141_v45 = vpop.f32.mrf.mxu0 }
  0xa7   :  { %v142_v46 = vadd.f32 %v141_v45, %v93_v36 }
  0xa9   :  { %v177_v48 = vmax.f32 %v142_v46, 0.0 }
  0xab   :  { %v191_v49 = vpack.c.bf16 %v177_v48, %v176_v47 }
  0xad   :  { %260 = vmatmul.bf16.gmra.mxu1 %v191_v49 }
  0xae   :  { %v144_v50 = vpop.f32.mrf.mxu0 }
  0xaf   :  { %v145_v51 = vadd.f32 %v144_v50, %v93_v36 }
  0xb1   :  { %v178_v54 = vmax.f32 %v145_v51, 0.0 }
  0xb6   :  { %v146_v52 = vpop.f32.mrf.mxu0 }
  0xb7   :  { %v147_v53 = vadd.f32 %v146_v52, %v93_v36 }
  0xb9   :  { %v179_v55 = vmax.f32 %v147_v53, 0.0 }
  0xbb   :  { %v192_v56 = vpack.c.bf16 %v179_v55, %v178_v54 }
  0xbd   :  { %265 = vmatmul.bf16.gmra.mxu1 %v192_v56 }
  0xbe   :  { %v149_v57 = vpop.f32.mrf.mxu0 }
  0xbf   :  { %v150_v58 = vadd.f32 %v149_v57, %v93_v36 }
  0xc1   :  { %v180_v61 = vmax.f32 %v150_v58, 0.0 }
  0xc6   :  { %v151_v59 = vpop.f32.mrf.mxu0 }
  0xc7   :  { %v152_v60 = vadd.f32 %v151_v59, %v93_v36 }
  0xc9   :  { %v181_v62 = vmax.f32 %v152_v60, 0.0 }
  0xcb   :  { %v193_v63 = vpack.c.bf16 %v181_v62, %v180_v61 }
  0xcd   :  { %270 = vmatmul.bf16.gmra.mxu1 %v193_v63 }
  0xce   :  { %v154_v0 = vpop.f32.mrf.mxu0 }
  0xcf   :  { %v155_v1 = vadd.f32 %v154_v0, %v93_v36 }
  0xd1   :  { %v182_v4 = vmax.f32 %v155_v1, 0.0 }
  0xd6   :  { %v156_v2 = vpop.f32.mrf.mxu0 }
  0xd7   :  { %v157_v3 = vadd.f32 %v156_v2, %v93_v36 }
  0xd9   :  { %v183_v5 = vmax.f32 %v157_v3, 0.0 }
  0xdb   :  { %v194_v6 = vpack.c.bf16 %v183_v5, %v182_v4 }
  0xdd   :  { %275 = vmatmul.bf16.gmra.mxu1 %v194_v6 }
  0xde   :  { %v159_v7 = vpop.f32.mrf.mxu0 }
  0xdf   :  { %v160_v8 = vadd.f32 %v159_v7, %v93_v36 }
  0xe1   :  { %v184_v11 = vmax.f32 %v160_v8, 0.0 }
  0xe6   :  { %v161_v9 = vpop.f32.mrf.mxu0 }
  0xe7   :  { %v162_v10 = vadd.f32 %v161_v9, %v93_v36 }
  0xe9   :  { %v185_v12 = vmax.f32 %v162_v10, 0.0 }
  0xeb   :  { %v195_v13 = vpack.c.bf16 %v185_v12, %v184_v11 }
  0xed   :  { %280 = vmatmul.bf16.vlgmr.msra.gmra.mxu3 %v195_v13 }
  0xee   :  { %v164_v14 = vpop.f32.mrf.mxu0 }
  0xef   :  { %v165_v15 = vadd.f32 %v164_v14, %v93_v36 }
  0xf1   :  { %v186_v18 = vmax.f32 %v165_v15, 0.0 }
  0xf6   :  { %v166_v16 = vpop.f32.mrf.mxu0 }
  0xf7   :  { %v167_v17 = vadd.f32 %v166_v16, %v93_v36 }
  0xf9   :  { %v187_v19 = vmax.f32 %v167_v17, 0.0 }
  0xfb   :  { %v196_v20 = vpack.c.bf16 %v187_v19, %v186_v18  ;;  %v91_v19 = vld [vmem:[#allocation5 + $0x50] sm:$0x1] }
  0xfd   :  { %285 = vmatmul.bf16.gmra.mxu3 %v196_v20  ;;  %v92_v20 = vunpack.c.l.bf16 %v91_v19 }
  0xfe   :  { %v169_v21 = vpop.f32.mrf.mxu0 }
  0xff   :  { %v170_v22 = vadd.f32 %v169_v21, %v93_v36 }
 0x101   :  { %v188_v25 = vmax.f32 %v170_v22, 0.0  ;;  %v512_v22 = vmov 0  }
 0x102   :  { %427 = vset.pattern.permute.xlu0 %v512_v22 }
 0x103   :  { %322 = vperm.xlu0 %427, %v92_v20  }
 0x106   :  { %v171_v23 = vpop.f32.mrf.mxu0 }
 0x107   :  { %v172_v24 = vadd.f32 %v171_v23, %v93_v36 }
 0x109   :  { %v189_v26 = vmax.f32 %v172_v24, 0.0 }
 0x10b   :  { %v197_v27 = vpack.c.bf16 %v189_v26, %v188_v25 }
 0x10d   :  { %290 = vmatmul.bf16.gmra.mxu3 %v197_v27 }
 0x11a   :  { %v256_v30 = vpop.f32.mrf.mxu1 }
 0x11b   :  { %v257_v32 = vadd.f32 %v256_v30, %v198_v31 }
 0x11d   :  { %v296_v35 = vmax.f32 %v257_v32, 0.0 }
 0x122   :  { %v258_v33 = vpop.f32.mrf.mxu1 }
 0x123   :  { %v259_v34 = vadd.f32 %v258_v33, %v198_v31 }
 0x125   :  { %v297_v37 = vmax.f32 %v259_v34, 0.0 }
 0x127   :  { %v312_v38 = vpack.c.bf16 %v297_v37, %v296_v35 }
 0x12a   :  { %v261_v39 = vpop.f32.mrf.mxu1 }
 0x12b   :  { %v262_v40 = vadd.f32 %v261_v39, %v198_v31 }
 0x12d   :  { %v298_v43 = vmax.f32 %v262_v40, 0.0 }
 0x132   :  { %v263_v41 = vpop.f32.mrf.mxu1 }
 0x133   :  { %v264_v42 = vadd.f32 %v263_v41, %v198_v31 }
 0x135   :  { %v299_v36 = vmax.f32 %v264_v42, 0.0 }
 0x137   :  { %v313_v44 = vpack.c.bf16 %v299_v36, %v298_v43 }
 0x13a   :  { %v266_v46 = vpop.f32.mrf.mxu1 }
 0x13b   :  { %v267_v21 = vadd.f32 %v266_v46, %v198_v31 }
 0x13d   :  { %v300_v24 = vmax.f32 %v267_v21, 0.0 }
 0x142   :  { %v268_v49 = vpop.f32.mrf.mxu1 }
 0x143   :  { %v269_v17 = vadd.f32 %v268_v49, %v198_v31 }
 0x145   :  { %v301_v23 = vmax.f32 %v269_v17, 0.0 }
 0x147   :  { %v314_v25 = vpack.c.bf16 %v301_v23, %v300_v24 }
 0x14a   :  { %v271_v51 = vpop.f32.mrf.mxu1 }
 0x14b   :  { %v272_v14 = vadd.f32 %v271_v51, %v198_v31 }
 0x14d   :  { %v302_v16 = vmax.f32 %v272_v14, 0.0 }
 0x152   :  { %v273_v53 = vpop.f32.mrf.mxu1 }
 0x153   :  { %v274_v12 = vadd.f32 %v273_v53, %v198_v31 }
 0x155   :  { %v303_v15 = vmax.f32 %v274_v12, 0.0 }
 0x157   :  { %v315_v18 = vpack.c.bf16 %v303_v15, %v302_v16 }
 0x15a   :  { %v276_v62 = vpop.f32.mrf.mxu1 }
 0x15b   :  { %v277_v9 = vadd.f32 %v276_v62, %v198_v31 }
 0x15d   :  { %v304_v11 = vmax.f32 %v277_v9, 0.0 }
 0x162   :  { %v278_v5 = vpop.f32.mrf.mxu1 }
 0x163   :  { %v279_v7 = vadd.f32 %v278_v5, %v198_v31 }
 0x165   :  { %v305_v10 = vmax.f32 %v279_v7, 0.0 }
 0x167   :  { %v316_v13 = vpack.c.bf16 %v305_v10, %v304_v11 }
 0x170   :  { %v281_v45 = vpop.f32.mrf.mxu3 }
 0x171   :  { %v282_v3 = vadd.f32 %v281_v45, %v198_v31 }
 0x173   :  { %v306_v6 = vmax.f32 %v282_v3, 0.0 }
 0x175   :  { %v323_v26 = vpop.permute.xlu0 %322 }
 0x176   :  { %v324_v27 = vrot.slane %v323_v26, 1 }
 0x178   :  { %v283_v47 = vpop.f32.mrf.mxu3 }
 0x179   :  { %v284_v1 = vadd.f32 %v283_v47, %v198_v31 }
 0x17b   :  { %v307_v4 = vmax.f32 %v284_v1, 0.0 }
 0x17d   :  { %v317_v8 = vpack.c.bf16 %v307_v4, %v306_v6 }
 0x180   :  { %v286_v48 = vpop.f32.mrf.mxu3 }
 0x181   :  { %v287_v61 = vadd.f32 %v286_v48, %v198_v31 }
 0x183   :  { %v308_v0 = vmax.f32 %v287_v61, 0.0 }
 0x188   :  { %v288_v50 = vpop.f32.mrf.mxu3 }
 0x189   :  { %v289_v59 = vadd.f32 %v288_v50, %v198_v31 }
 0x18b   :  { %v309_v63 = vmax.f32 %v289_v59, 0.0 }
 0x18d   :  { %v318_v2 = vpack.c.bf16 %v309_v63, %v308_v0 }
 0x190   :  { %v291_v52 = vpop.f32.mrf.mxu3 }
 0x191   :  { %v292_v54 = vadd.f32 %v291_v52, %v198_v31 }
 0x193   :  { %v310_v57 = vmax.f32 %v292_v54, 0.0 }
 0x198   :  { %v293_v55 = vpop.f32.mrf.mxu3 }
 0x199   :  { %v294_v56 = vadd.f32 %v293_v55, %v198_v31 }
 0x19b   :  { %v311_v58 = vmax.f32 %v294_v56, 0.0 }
 0x19d   :  { %v319_v60 = vpack.c.bf16 %v311_v58, %v310_v57 }
 0x19f   :  { %326 = vmatpush.bf16.xpose.msra.mxu2 %v319_v60 }
 0x1a7   :  { %327 = vmatpush.bf16.xpose.msra.mxu2 %v318_v2 }
 0x1af   :  { %328 = vmatpush.bf16.xpose.msra.mxu2 %v317_v8 }
 0x1b7   :  { %329 = vmatpush.bf16.xpose.msra.mxu2 %v316_v13 }
 0x1bf   :  { %330 = vmatpush.bf16.xpose.msra.mxu2 %v315_v18 }
 0x1c7   :  { %331 = vmatpush.bf16.xpose.msra.mxu2 %v314_v25 }
 0x1cf   :  { %332 = vmatpush.bf16.xpose.msra.mxu2 %v313_v44 }
 0x1d7   :  { %333 = vmatpush.bf16.xpose.msra.mxu2 %v312_v38 }
 0x1de   :  { %334 = vmatmul.bf16.vlgmr.msra.gmra.mxu2 %v91_v19 }
 0x261   :  { %v335_v28 = vpop.f32.mrf.mxu2 }
 0x262   :  { %v336_v29 = vadd.f32 %v335_v28, %v324_v27 }
 0x264   :  { %339 = vst [vmem:[#allocation7] sm:$0x1] %v336_v29 }
 0x265   :  { %350 = dma.vmem_to_hbm [thread:$0]  %s346_s1, 16, %s348_s25, [#allocation4]  }
 0x269   :  { %v337_v30 = vpop.f32.mrf.mxu2 }
 0x26a   :  { %504 = dma.done.wait [#allocation4], 16  }
 0x26b   :  { %505 = vsyncadd [#allocation4], 4294967280 }
 0x26c   :  { %355 = vsyncpa [#allocation3], 1 }
 0x26d   :  { %356 = vsyncpa [#allocation6], 1 }
 0x26e   :  { %357 = vsyncpa [#allocation4], 1 }

</bundles_post_ra>
